<compile_context>
chip_gen: v7x
topology: tpu7x:2x2x1
jax: 0.10.0
libtpu: 0.0.40
codegen_flags: <defaults>
</compile_context>

<pallas_src>
import functools

import jax
import jax.numpy as jnp
from jax.experimental import pallas as pl
from jax.experimental.pallas import tpu as pltpu

LANE = 128      # lane width of a vreg (last dim)
SUBLANE = 8     # sublane count of a vreg (second-to-last dim)
MAX_BLOCK_B = 4096  # per-grid-step batch-tile cap (~20 MiB VMEM at f32 intermediates)


def _round_up(n, m):
    return (n + m - 1) // m * m


def _tensorcore_count():
    """TensorCores per chip: 2 on v7x, 1 on v5e/v6e.  Probed defensively so a
    failed lookup can never break the kernel (worst case: grid=(1,))."""
    try:
        info = pltpu.get_tpu_info()
        for attr in ("num_cores", "core_count", "num_tensorcores", "tensorcore_count"):
            n = getattr(info, attr, None)
            if isinstance(n, int) and n > 0:
                return n
    except Exception:
        pass
    try:
        kind = jax.devices()[0].device_kind.lower()
        if "v7" in kind or "7x" in kind:
            return 2
    except Exception:
        pass
    return 1


def _soft_q_kernel(x_ref, w1_ref, b1_ref, w2_ref, b2_ref, w3_ref, b3_ref, o_ref):
    # One batch tile per grid step; all three matmuls + ReLUs fused in VMEM.
    # Weights are bf16 (native MXU input), accumulation is f32, biases f32.
    x = x_ref[...].astype(jnp.bfloat16)                                   # [TB, Dp]
    h1 = jnp.dot(x, w1_ref[...], preferred_element_type=jnp.float32)      # [TB, H]
    h1 = jnp.maximum(h1 + b1_ref[...], 0.0).astype(jnp.bfloat16)
    h2 = jnp.dot(h1, w2_ref[...], preferred_element_type=jnp.float32)     # [TB, H]
    h2 = jnp.maximum(h2 + b2_ref[...], 0.0).astype(jnp.bfloat16)
    q = jnp.dot(h2, w3_ref[...], preferred_element_type=jnp.float32)      # [TB, Ap]
    o_ref[...] = (q + b3_ref[...]).astype(o_ref.dtype)


@functools.partial(
    jax.jit, static_argnames=("obs_dim", "n_actions", "max_block_b", "num_cores")
)
def _soft_q_forward_impl(x, w1, b1, w2, b2, w3, b3, *, obs_dim, n_actions,
                         max_block_b, num_cores):
    B = x.shape[0]
    d_pad, hidden = w1.shape          # lane-padded obs dim, hidden width
    a_pad = w3.shape[1]               # lane-padded action dim

    # Batch tiling: exactly `num_cores` grid steps (1 on v5e/v6e, 2 on v7x),
    # unless the resulting tile would exceed max_block_b rows.
    b_pad = _round_up(max(B, SUBLANE), SUBLANE)
    tb = _round_up(pl.cdiv(b_pad, num_cores), SUBLANE)
    tb = max(SUBLANE, min(tb, max_block_b, b_pad))
    b_pad = _round_up(b_pad, tb)
    grid = (b_pad // tb,)

    # Zero-padding keeps the math exact: padded x rows/cols hit zero weight rows.
    x_p = jnp.pad(x, ((0, b_pad - B), (0, d_pad - obs_dim)))

    flops = 2 * B * (obs_dim * hidden + hidden * hidden + hidden * n_actions)
    bytes_accessed = (
        4 * (b_pad * d_pad + b_pad * a_pad)                       # x + q (f32)
        + 2 * (d_pad * hidden + hidden * hidden + hidden * a_pad)  # bf16 weights
        + 4 * (2 * hidden + a_pad)                                 # f32 biases
    )

    out = pl.pallas_call(
        _soft_q_kernel,
        out_shape=jax.ShapeDtypeStruct((b_pad, a_pad), jnp.float32),
        grid_spec=pltpu.PrefetchScalarGridSpec(
            num_scalar_prefetch=0,
            grid=grid,
            in_specs=[
                pl.BlockSpec((tb, d_pad), lambda i: (i, 0)),       # x: tiled over B
                pl.BlockSpec((d_pad, hidden), lambda i: (0, 0)),   # w1: VMEM-resident
                pl.BlockSpec((1, hidden), lambda i: (0, 0)),       # b1
                pl.BlockSpec((hidden, hidden), lambda i: (0, 0)),  # w2
                pl.BlockSpec((1, hidden), lambda i: (0, 0)),       # b2
                pl.BlockSpec((hidden, a_pad), lambda i: (0, 0)),   # w3
                pl.BlockSpec((1, a_pad), lambda i: (0, 0)),        # b3
            ],
            out_specs=pl.BlockSpec((tb, a_pad), lambda i: (i, 0)),
        ),
        compiler_params=pltpu.CompilerParams(
            dimension_semantics=("parallel",),   # megacore-shard batch on v7x
            vmem_limit_bytes=32 * 1024 * 1024,   # > v5e's 16 MiB scoped default
        ),
        cost_estimate=pl.CostEstimate(
            flops=flops, transcendentals=0, bytes_accessed=bytes_accessed
        ),
    )(x_p, w1, b1, w2, b2, w3, b3)

    return out[:B, :n_actions]


def prepare_params(params):
    """One-time parameter preparation (run OUTSIDE the per-step forward):
    lane-pad obs_dim/n_actions to 128 and cast weights to bf16 (biases stay f32).
    Returns (prepared_dict, meta_dict)."""
    obs_dim, hidden = params["w1"].shape
    n_actions = params["w3"].shape[1]
    d_pad = _round_up(max(obs_dim, LANE), LANE)
    a_pad = _round_up(max(n_actions, LANE), LANE)

    prepped = {
        "w1": jnp.pad(params["w1"], ((0, d_pad - obs_dim), (0, 0))).astype(jnp.bfloat16),
        "b1": params["b1"].astype(jnp.float32),
        "w2": params["w2"].astype(jnp.bfloat16),
        "b2": params["b2"].astype(jnp.float32),
        "w3": jnp.pad(params["w3"], ((0, 0), (0, a_pad - n_actions))).astype(jnp.bfloat16),
        "b3": jnp.pad(params["b3"], ((0, 0), (0, a_pad - n_actions))).astype(jnp.float32),
    }
    meta = {"obs_dim": int(obs_dim), "n_actions": int(n_actions)}
    return prepped, meta


def soft_q_forward(x, prepped, meta, max_block_b=MAX_BLOCK_B, num_cores=None):
    """x: [B, obs_dim] f32.  prepped/meta: output of prepare_params()."""
    if num_cores is None:
        num_cores = _tensorcore_count()
    return _soft_q_forward_impl(
        x, prepped["w1"], prepped["b1"], prepped["w2"], prepped["b2"],
        prepped["w3"], prepped["b3"],
        obs_dim=meta["obs_dim"], n_actions=meta["n_actions"],
        max_block_b=max_block_b, num_cores=num_cores,
    )


def init_params(key, obs_dim, n_actions, hidden=256):
    """Deterministic init mimicking torch.nn.Linear default (U[-1/sqrt(fan_in), +])."""
    def linear(key, fan_in, fan_out):
        kw, kb = jax.random.split(key)
        bound = 1.0 / jnp.sqrt(fan_in)
        # stored transposed relative to PyTorch: (in, out)
        w = jax.random.uniform(kw, (fan_in, fan_out), jnp.float32, -bound, bound)
        b = jax.random.uniform(kb, (1, fan_out), jnp.float32, -bound, bound)
        return w, b

    k1, k2, k3 = jax.random.split(key, 3)
    w1, b1 = linear(k1, obs_dim, hidden)
    w2, b2 = linear(k2, hidden, hidden)
    w3, b3 = linear(k3, hidden, n_actions)
    return {"w1": w1, "b1": b1, "w2": w2, "b2": b2, "w3": w3, "b3": b3}


def reference_forward(x, p):
    h1 = jnp.maximum(x @ p["w1"] + p["b1"], 0.0)
    h2 = jnp.maximum(h1 @ p["w2"] + p["b2"], 0.0)
    return h2 @ p["w3"] + p["b3"]


if __name__ == "__main__":
    key = jax.random.PRNGKey(0)
    k_x, k_p, k_xb = jax.random.split(key, 3)

    B, OBS_DIM, N_ACTIONS, HIDDEN = 2, 8, 4, 256
    x = jax.random.normal(k_x, (B, OBS_DIM), jnp.float32)
    params = init_params(k_p, OBS_DIM, N_ACTIONS, HIDDEN)

    # One-time param preparation (padding + bf16 cast hoisted out of the forward).
    prepped, meta = prepare_params(params)

    # bf16 weights / activations => compare against the f32 reference at ~2e-2.
    TOL = 2e-2

    # Actor-loop-sized batch (B=2): padded to one 8x128 tile internally, grid=(1,).
    q = jax.block_until_ready(soft_q_forward(x, prepped, meta))
    q_ref = reference_forward(x, params)
    assert q.shape == (B, N_ACTIONS)
    assert jnp.allclose(q, q_ref, atol=TOL, rtol=TOL), "mismatch vs reference (B=2)"

    # Training-sized batch: one big tile per TensorCore (grid=(1,) or (2,)).
    BT = 512
    xb = jax.random.normal(k_xb, (BT, OBS_DIM), jnp.float32)
    qb = jax.block_until_ready(soft_q_forward(xb, prepped, meta))
    qb_ref = reference_forward(xb, params)
    assert qb.shape == (BT, N_ACTIONS)
    assert jnp.allclose(qb, qb_ref, atol=TOL, rtol=TOL), "mismatch vs reference (B=512)"

    print("KERNEL_OK")
</pallas_src>

<mosaic_0001>
module attributes {stable_mosaic.version = 11 : i64} {
  func.func @_soft_q_kernel(%arg0: i32, %arg1: memref<8x128xf32, #tpu.memory_space<vmem>>, %arg2: memref<128x256xbf16, #tpu.memory_space<vmem>>, %arg3: memref<1x256xf32, #tpu.memory_space<vmem>>, %arg4: memref<256x256xbf16, #tpu.memory_space<vmem>>, %arg5: memref<1x256xf32, #tpu.memory_space<vmem>>, %arg6: memref<256x128xbf16, #tpu.memory_space<vmem>>, %arg7: memref<1x128xf32, #tpu.memory_space<vmem>>, %arg8: memref<8x128xf32, #tpu.memory_space<vmem>>) attributes {dimension_semantics = [#tpu.dimension_semantics<parallel>], iteration_bounds = array<i64: 1>, scalar_prefetch = 0 : i64, scratch_operands = 0 : i64, tpu.core_type = #tpu.core_type<tc>, window_params = [{transform_indices = @transform_0, window_bounds = array<i64: 8, 128>}, {pipeline_mode = #tpu.pipeline_mode<synchronous>, transform_indices = @transform_1, window_bounds = array<i64: 128, 256>}, {pipeline_mode = #tpu.pipeline_mode<synchronous>, transform_indices = @transform_2, window_bounds = array<i64: 1, 256>}, {pipeline_mode = #tpu.pipeline_mode<synchronous>, transform_indices = @transform_3, window_bounds = array<i64: 256, 256>}, {pipeline_mode = #tpu.pipeline_mode<synchronous>, transform_indices = @transform_4, window_bounds = array<i64: 1, 256>}, {pipeline_mode = #tpu.pipeline_mode<synchronous>, transform_indices = @transform_5, window_bounds = array<i64: 256, 128>}, {pipeline_mode = #tpu.pipeline_mode<synchronous>, transform_indices = @transform_6, window_bounds = array<i64: 1, 128>}, {transform_indices = @transform_7, window_bounds = array<i64: 8, 128>}]} {
    %c0 = arith.constant 0 : index
    %c0_0 = arith.constant 0 : index
    %0 = vector.load %arg1[%c0, %c0_0] : memref<8x128xf32, #tpu.memory_space<vmem>>, vector<8x128xf32>
    %1 = arith.truncf %0 : vector<8x128xf32> to vector<8x128xbf16>
    %c0_1 = arith.constant 0 : index
    %c0_2 = arith.constant 0 : index
    %2 = vector.load %arg2[%c0_1, %c0_2] : memref<128x256xbf16, #tpu.memory_space<vmem>>, vector<128x256xbf16>
    %cst = arith.constant dense<0.000000e+00> : vector<8x256xf32>
    %3 = tpu.matmul %1, %2, %cst {dimension_numbers = #tpu.dot_dimension_numbers<[1], [0], [0], [1], [0, 0, 1, 1], [], []>} : vector<8x128xbf16>, vector<128x256xbf16>, vector<8x256xf32> -> vector<8x256xf32>
    %c0_3 = arith.constant 0 : index
    %c0_4 = arith.constant 0 : index
    %4 = vector.load %arg3[%c0_3, %c0_4] : memref<1x256xf32, #tpu.memory_space<vmem>>, vector<1x256xf32>
    %5 = vector.broadcast %4 : vector<1x256xf32> to vector<8x256xf32>
    %6 = arith.addf %3, %5 : vector<8x256xf32>
    %cst_5 = arith.constant 0.000000e+00 : f32
    %7 = vector.broadcast %cst_5 : f32 to vector<8x256xf32>
    %8 = arith.maximumf %6, %7 : vector<8x256xf32>
    %9 = arith.truncf %8 : vector<8x256xf32> to vector<8x256xbf16>
    %c0_6 = arith.constant 0 : index
    %c0_7 = arith.constant 0 : index
    %10 = vector.load %arg4[%c0_6, %c0_7] : memref<256x256xbf16, #tpu.memory_space<vmem>>, vector<256x256xbf16>
    %cst_8 = arith.constant dense<0.000000e+00> : vector<8x256xf32>
    %11 = tpu.matmul %9, %10, %cst_8 {dimension_numbers = #tpu.dot_dimension_numbers<[1], [0], [0], [1], [0, 0, 1, 1], [], []>} : vector<8x256xbf16>, vector<256x256xbf16>, vector<8x256xf32> -> vector<8x256xf32>
    %c0_9 = arith.constant 0 : index
    %c0_10 = arith.constant 0 : index
    %12 = vector.load %arg5[%c0_9, %c0_10] : memref<1x256xf32, #tpu.memory_space<vmem>>, vector<1x256xf32>
    %13 = vector.broadcast %12 : vector<1x256xf32> to vector<8x256xf32>
    %14 = arith.addf %11, %13 : vector<8x256xf32>
    %cst_11 = arith.constant 0.000000e+00 : f32
    %15 = vector.broadcast %cst_11 : f32 to vector<8x256xf32>
    %16 = arith.maximumf %14, %15 : vector<8x256xf32>
    %17 = arith.truncf %16 : vector<8x256xf32> to vector<8x256xbf16>
    %c0_12 = arith.constant 0 : index
    %c0_13 = arith.constant 0 : index
    %18 = vector.load %arg6[%c0_12, %c0_13] : memref<256x128xbf16, #tpu.memory_space<vmem>>, vector<256x128xbf16>
    %cst_14 = arith.constant dense<0.000000e+00> : vector<8x128xf32>
    %19 = tpu.matmul %17, %18, %cst_14 {dimension_numbers = #tpu.dot_dimension_numbers<[1], [0], [0], [1], [0, 0, 1, 1], [], []>} : vector<8x256xbf16>, vector<256x128xbf16>, vector<8x128xf32> -> vector<8x128xf32>
    %c0_15 = arith.constant 0 : index
    %c0_16 = arith.constant 0 : index
    %20 = vector.load %arg7[%c0_15, %c0_16] : memref<1x128xf32, #tpu.memory_space<vmem>>, vector<1x128xf32>
    %21 = vector.broadcast %20 : vector<1x128xf32> to vector<8x128xf32>
    %22 = arith.addf %19, %21 : vector<8x128xf32>
    %c0_17 = arith.constant 0 : index
    %c0_18 = arith.constant 0 : index
    %23 = vector.load %arg8[%c0_17, %c0_18] : memref<8x128xf32, #tpu.memory_space<vmem>>, vector<8x128xf32>
    tpu.vector_store %arg8[%c0_17, %c0_18], %22 {strides = array<i32>} : memref<8x128xf32, #tpu.memory_space<vmem>>, vector<8x128xf32>,
    return
  }
  func.func @transform_0(%arg0: i32) -> (i32, i32) {
    %c0_i32 = arith.constant 0 : i32
    %c0_i32_0 = arith.constant 0 : i32
    return %arg0, %c0_i32 : i32, i32
  }
  func.func @transform_1(%arg0: i32) -> (i32, i32) {
    %c0_i32 = arith.constant 0 : i32
    %c0_i32_0 = arith.constant 0 : i32
    %c0_i32_1 = arith.constant 0 : i32
    return %c0_i32, %c0_i32_0 : i32, i32
  }
  func.func @transform_2(%arg0: i32) -> (i32, i32) {
    %c0_i32 = arith.constant 0 : i32
    %c0_i32_0 = arith.constant 0 : i32
    %c0_i32_1 = arith.constant 0 : i32
    return %c0_i32, %c0_i32_0 : i32, i32
  }
  func.func @transform_3(%arg0: i32) -> (i32, i32) {
    %c0_i32 = arith.constant 0 : i32
    %c0_i32_0 = arith.constant 0 : i32
    %c0_i32_1 = arith.constant 0 : i32
    return %c0_i32, %c0_i32_0 : i32, i32
  }
  func.func @transform_4(%arg0: i32) -> (i32, i32) {
    %c0_i32 = arith.constant 0 : i32
    %c0_i32_0 = arith.constant 0 : i32
    %c0_i32_1 = arith.constant 0 : i32
    return %c0_i32, %c0_i32_0 : i32, i32
  }
  func.func @transform_5(%arg0: i32) -> (i32, i32) {
    %c0_i32 = arith.constant 0 : i32
    %c0_i32_0 = arith.constant 0 : i32
    %c0_i32_1 = arith.constant 0 : i32
    return %c0_i32, %c0_i32_0 : i32, i32
  }
  func.func @transform_6(%arg0: i32) -> (i32, i32) {
    %c0_i32 = arith.constant 0 : i32
    %c0_i32_0 = arith.constant 0 : i32
    %c0_i32_1 = arith.constant 0 : i32
    return %c0_i32, %c0_i32_0 : i32, i32
  }
  func.func @transform_7(%arg0: i32) -> (i32, i32) {
    %c0_i32 = arith.constant 0 : i32
    %c0_i32_0 = arith.constant 0 : i32
    return %arg0, %c0_i32 : i32, i32
  }
}

</mosaic_0001>

<bundles_post_ra>
// kernel: _soft_q_forward_impl.1
= control target key start
LH: loop header
LB: loop body
LE: loop exit
PB: predicated region body
PF: predicated region fallthrough
CT: control target
= control target key end

     0   :  { %12 = vsyncpa [#allocation3], 0  ;;  %s1013_s0 = inlined_call_operand.vmem [shape: f32[8,128], index: 0, kind: input, shape index: {}]   ;;  %s1014_s1 = inlined_call_operand.hbm [shape: bf16[128,256], index: 1, kind: input, shape index: {}]   ;;  %s1015_s2 = inlined_call_operand.vmem [shape: f32[1,256], index: 2, kind: input, shape index: {}]   ;;  %s1016_s3 = inlined_call_operand.hbm [shape: bf16[256,256], index: 3, kind: input, shape index: {}]   ;;  %s1017_s4 = inlined_call_operand.vmem [shape: f32[1,256], index: 4, kind: input, shape index: {}]   ;;  %s1018_s5 = inlined_call_operand.hbm [shape: bf16[256,128], index: 5, kind: input, shape index: {}]   ;;  %s1019_s6 = inlined_call_operand.vmem [shape: f32[1,128], index: 6, kind: input, shape index: {}]   ;;  %s1020_s7 = inlined_call_operand.vmem [shape: f32[8,128], index: 7, kind: output, shape index: {}]  }
   0x1   :  { %13 = vsyncpa [#allocation5], 0  ;;  %s907_s24 = smov [#allocation4]   ;;  %s908_s26 = smov [#allocation2]  }
   0x2   :  { %s35_s25 = sshll.u32 %s907_s24, 4  ;;  %s21_s27 = sshll.u32 %s908_s26, 4  ;;  %s36_s25 = int_to_ptr.vmem [resolvable:$true] %s35_s25  ;;  %s955_s27 = int_to_ptr.vmem [resolvable:$true] %s21_s27 }
   0x3   :  { %s837_s30 = scalar_lea.hbm %s1016_s3, 4096 }
   0x4   :  { %p838_p0 = scmp.ne.s32.totalorder %s1016_s3, %s837_s30  ;;  %p841_p1 = scmp.lt.u32.totalorder %s837_s30, %s1016_s3 }
   0x6   :  { %p843_p2 = pnand %p841_p1, %p838_p0 }
   0x8   :  { %846 = shalt.err (!%p843_p2)
}
   0x9   :  { %s847_s12 = scalar_lea.vmem %s36_s25, 4096  ;;  %p852_p4 = scmp.lt.s32.totalorder %s36_s25, %s36_s25 }
   0xa   :  { %p848_p3 = scmp.ne.s32.totalorder %s36_s25, %s847_s12  ;;  %p853_p5 = scmp.lt.s32.totalorder %s847_s12, %s847_s12 }
   0xc   :  { %p854_p6 = por %p853_p5, %p852_p4 }
   0xe   :  { %p855_p7 = pnand %p854_p6, %p848_p3 }
  0x10   :  { %858 = shalt.err (!%p855_p7)
}
  0x11   :  { %s909_s13 = smov 128   ;;  %s910_s14 = smov 8  }
  0x12   :  { %41 = dma.hbm_to_vmem [thread:$0]  %s1016_s3, 4096, %s36_s25, [#allocation5], %s909_s13, %s909_s13, %s910_s14  }
  0x13   :  { %s859_s19 = scalar_lea.hbm %s1014_s1, 2048 }
  0x14   :  { %p860_p8 = scmp.ne.s32.totalorder %s1014_s1, %s859_s19  ;;  %p863_p9 = scmp.lt.u32.totalorder %s859_s19, %s1014_s1 }
  0x16   :  { %p865_p10 = pnand %p863_p9, %p860_p8 }
  0x18   :  { %868 = shalt.err (!%p865_p10)
}
  0x19   :  { %s869_s24 = scalar_lea.vmem %s955_s27, 2048  ;;  %p874_p12 = scmp.lt.s32.totalorder %s955_s27, %s955_s27 }
  0x1a   :  { %p870_p11 = scmp.ne.s32.totalorder %s955_s27, %s869_s24  ;;  %p875_p13 = scmp.lt.s32.totalorder %s869_s24, %s869_s24 }
  0x1c   :  { %p876_p0 = por %p875_p13, %p874_p12 }
  0x1e   :  { %p877_p1 = pnand %p876_p0, %p870_p11 }
  0x20   :  { %880 = shalt.err (!%p877_p1)
}
  0x21   :  { %27 = dma.hbm_to_vmem [thread:$0]  %s1014_s1, 2048, %s955_s27, [#allocation3], %s909_s13, %s909_s13, %s910_s14  }
  0x22   :  { %s911_s26 = smov [#allocation6]   ;;  %s881_s8 = scalar_lea.hbm %s1018_s5, 2048 }
  0x23   :  { %s49_s28 = sshll.u32 %s911_s26, 4  ;;  %p882_p2 = scmp.ne.s32.totalorder %s1018_s5, %s881_s8  ;;  %s50_s28 = int_to_ptr.vmem [resolvable:$true] %s49_s28 }
  0x24   :  { %p885_p3 = scmp.lt.u32.totalorder %s881_s8, %s1018_s5 }
  0x26   :  { %p887_p4 = pnand %p885_p3, %p882_p2 }
  0x28   :  { %890 = shalt.err (!%p887_p4)
}
  0x29   :  { %s891_s15 = scalar_lea.vmem %s50_s28, 2048  ;;  %p896_p6 = scmp.lt.s32.totalorder %s50_s28, %s50_s28 }
  0x2a   :  { %p892_p5 = scmp.ne.s32.totalorder %s50_s28, %s891_s15  ;;  %p897_p7 = scmp.lt.s32.totalorder %s891_s15, %s891_s15 }
  0x2c   :  { %p898_p8 = por %p897_p7, %p896_p6 }
  0x2e   :  { %p899_p9 = pnand %p898_p8, %p892_p5 }
  0x30   :  { %902 = shalt.err (!%p899_p9)
}
  0x31   :  { %s912_s1 = smov 64   ;;  %s913_s27 = smov 4  }
  0x32   :  { %55 = dma.hbm_to_vmem [thread:$0]  %s1018_s5, 2048, %s50_s28, [#allocation5], %s912_s1, %s912_s1, %s913_s27  }
  0x33   :  { %903 = dma.done.wait [#allocation3], 2048  }
  0x34   :  { %904 = vsyncadd [#allocation3], 4294965248 }
  0x35   :  { %905 = dma.done.wait [#allocation5], 6144  }
  0x36   :  { %906 = vsyncadd [#allocation5], 4294961152  ;;  %v914_v0 = vmov 0   ;;  %v749_v1 = vld [vmem:[#allocation2 + $0x4] ss:$8 sps:$4 sm:$0xff]   ;;  %v825_v55 = vld [vmem:[#allocation6 + $0x50] sm:$0xff]   ;;  %v88_v63 = vlaneseq }
  0x37   :  { %210 = vmatprep.mubr.bf16.mxu0 %v914_v0  ;;  %v751_v2 = vld [vmem:[#allocation2] ss:$8 sps:$4 sm:$0xff]   ;;  %178 = vmatprep.subr.bf16.mxu0 %v749_v1  ;;  %v752_v3 = vld [vmem:[#allocation2 + $0x14] ss:$8 sps:$4 sm:$0xff]   ;;  %v754_v4 = vld [vmem:[#allocation2 + $0x10] ss:$8 sps:$4 sm:$0xff]  }
  0x38   :  { %179 = vmatpush1.bf16.msra.mxu0 %v751_v2  ;;  %v755_v5 = vld [vmem:[#allocation2 + $0x24] ss:$8 sps:$4 sm:$0xff]   ;;  %v757_v6 = vld [vmem:[#allocation2 + $0x20] ss:$8 sps:$4 sm:$0xff]   ;;  %v758_v7 = vld [vmem:[#allocation2 + $0x34] ss:$8 sps:$4 sm:$0xff]  }
  0x39   :  { %180 = vmatprep.subr.bf16.mxu0 %v752_v3  ;;  %v760_v8 = vld [vmem:[#allocation2 + $0x30] ss:$8 sps:$4 sm:$0xff]   ;;  %v761_v9 = vld [vmem:[#allocation2 + $0x44] ss:$8 sps:$4 sm:$0xff]   ;;  %v775_v11 = vld [vmem:[#allocation4] ss:$8 sps:$4 sm:$0xff]  }
  0x3a   :  { %v773_v10 = vld [vmem:[#allocation4 + $0x4] ss:$8 sps:$4 sm:$0xff]   ;;  %v776_v12 = vld [vmem:[#allocation4 + $0x14] ss:$8 sps:$4 sm:$0xff]   ;;  %v763_v13 = vld [vmem:[#allocation2 + $0x40] ss:$8 sps:$4 sm:$0xff]  }
  0x3b   :  { %427 = vmatprep.subr.bf16.mxu1 %v773_v10  ;;  %v778_v14 = vld [vmem:[#allocation4 + $0x10] ss:$8 sps:$4 sm:$0xff]   ;;  %v779_v15 = vld [vmem:[#allocation4 + $0x24] ss:$8 sps:$4 sm:$0xff]   ;;  %v764_v16 = vld [vmem:[#allocation2 + $0x54] ss:$8 sps:$4 sm:$0xff]  }
  0x3c   :  { %181 = vmatpush1.bf16.msra.mxu0 %v754_v4  ;;  %428 = vmatpush1.bf16.msra.mxu1 %v775_v11  ;;  %v766_v17 = vld [vmem:[#allocation2 + $0x50] ss:$8 sps:$4 sm:$0xff]   ;;  %v781_v18 = vld [vmem:[#allocation4 + $0x20] ss:$8 sps:$4 sm:$0xff]   ;;  %v782_v19 = vld [vmem:[#allocation4 + $0x34] ss:$8 sps:$4 sm:$0xff]  }
  0x3d   :  { %182 = vmatprep.subr.bf16.mxu0 %v755_v5  ;;  %429 = vmatprep.subr.bf16.mxu1 %v776_v12  ;;  %v767_v20 = vld [vmem:[#allocation2 + $0x64] ss:$8 sps:$4 sm:$0xff]   ;;  %v769_v21 = vld [vmem:[#allocation2 + $0x60] ss:$8 sps:$4 sm:$0xff]   ;;  %v784_v22 = vld [vmem:[#allocation4 + $0x30] ss:$8 sps:$4 sm:$0xff]  }
  0x3e   :  { %v785_v23 = vld [vmem:[#allocation4 + $0x44] ss:$8 sps:$4 sm:$0xff]   ;;  %v770_v24 = vld [vmem:[#allocation2 + $0x74] ss:$8 sps:$4 sm:$0xff]   ;;  %v772_v25 = vld [vmem:[#allocation2 + $0x70] ss:$8 sps:$4 sm:$0xff]  }
  0x3f   :  { %v68_v26 = vld [vmem:[%s1013_s0] sm:$0xff]  ;;  %v788_v28 = vld [vmem:[#allocation4 + $0x54] ss:$8 sps:$4 sm:$0xff]   ;;  %v790_v29 = vld [vmem:[#allocation4 + $0x50] ss:$8 sps:$4 sm:$0xff]   ;;  %v89_v0 = vshrl.u32 %v88_v63, 7 }
  0x40   :  { %183 = vmatpush1.bf16.msra.mxu0 %v757_v6  ;;  %430 = vmatpush1.bf16.msra.mxu1 %v778_v14  ;;  %v787_v27 = vld [vmem:[#allocation4 + $0x40] ss:$8 sps:$4 sm:$0xff]   ;;  %v791_v30 = vld [vmem:[#allocation4 + $0x64] ss:$8 sps:$4 sm:$0xff]   ;;  %v69_v31 = vpack.c.bf16 %v68_v26, %v68_v26  ;;  %v794_v33 = vld [vmem:[#allocation4 + $0x74] ss:$8 sps:$4 sm:$0xff]  }
  0x41   :  { %184 = vmatprep.subr.bf16.mxu0 %v758_v7  ;;  %431 = vmatprep.subr.bf16.mxu1 %v779_v15  ;;  %v793_v32 = vld [vmem:[#allocation4 + $0x60] ss:$8 sps:$4 sm:$0xff]   ;;  %v796_v34 = vld [vmem:[#allocation4 + $0x70] ss:$8 sps:$4 sm:$0xff]   ;;  %v797_v35 = vld [vmem:[#allocation4 + $0x84] ss:$8 sps:$4 sm:$0xff]  }
  0x42   :  { %v799_v36 = vld [vmem:[#allocation4 + $0x80] ss:$8 sps:$4 sm:$0xff]   ;;  %v800_v37 = vld [vmem:[#allocation4 + $0x94] ss:$8 sps:$4 sm:$0xff]   ;;  %v802_v38 = vld [vmem:[#allocation4 + $0x90] ss:$8 sps:$4 sm:$0xff]  }
  0x43   :  { %v803_v39 = vld [vmem:[#allocation4 + $0xa4] ss:$8 sps:$4 sm:$0xff]   ;;  %v805_v40 = vld [vmem:[#allocation4 + $0xa0] ss:$8 sps:$4 sm:$0xff]   ;;  %v806_v41 = vld [vmem:[#allocation4 + $0xb4] ss:$8 sps:$4 sm:$0xff]  }
  0x44   :  { %185 = vmatpush1.bf16.msra.mxu0 %v760_v8  ;;  %432 = vmatpush1.bf16.msra.mxu1 %v781_v18  ;;  %v808_v42 = vld [vmem:[#allocation4 + $0xb0] ss:$8 sps:$4 sm:$0xff]   ;;  %v809_v43 = vld [vmem:[#allocation4 + $0xc4] ss:$8 sps:$4 sm:$0xff]   ;;  %v811_v44 = vld [vmem:[#allocation4 + $0xc0] ss:$8 sps:$4 sm:$0xff]  }
  0x45   :  { %186 = vmatprep.subr.bf16.mxu0 %v761_v9  ;;  %433 = vmatprep.subr.bf16.mxu1 %v782_v19  ;;  %v812_v45 = vld [vmem:[#allocation4 + $0xd4] ss:$8 sps:$4 sm:$0xff]   ;;  %v814_v46 = vld [vmem:[#allocation4 + $0xd0] ss:$8 sps:$4 sm:$0xff]   ;;  %v815_v47 = vld [vmem:[#allocation4 + $0xe4] ss:$8 sps:$4 sm:$0xff]  }
  0x46   :  { %v817_v48 = vld [vmem:[#allocation4 + $0xe0] ss:$8 sps:$4 sm:$0xff]   ;;  %v818_v49 = vld [vmem:[#allocation4 + $0xf4] ss:$8 sps:$4 sm:$0xff]   ;;  %v820_v50 = vld [vmem:[#allocation4 + $0xf0] ss:$8 sps:$4 sm:$0xff]  }
  0x47   :  { %v821_v51 = vld [vmem:[#allocation6 + $0x40] sm:$0xff]   ;;  %v823_v53 = vld [vmem:[#allocation6 + $0x48] sm:$0xff]   ;;  %v826_v56 = vld [vmem:[#allocation6 + $0x10] sm:$0xff]   ;;  %v90_v1 = vsub.s32 0, %v89_v0  ;;  %v94_v3 = vsub.s32 1, %v89_v0 }
  0x48   :  { %187 = vmatpush1.bf16.msra.mxu0 %v763_v13  ;;  %434 = vmatpush1.bf16.msra.mxu1 %v784_v22  ;;  %v822_v52 = vld [vmem:[#allocation6] sm:$0xff]   ;;  %v824_v54 = vld [vmem:[#allocation6 + $0x8] sm:$0xff]   ;;  %v827_v57 = vld [vmem:[#allocation6 + $0x58] sm:$0xff]  }
  0x49   :  { %188 = vmatprep.subr.bf16.mxu0 %v764_v16  ;;  %435 = vmatprep.subr.bf16.mxu1 %v785_v23  ;;  %v828_v58 = vld [vmem:[#allocation6 + $0x18] sm:$0xff]   ;;  %v829_v59 = vld [vmem:[#allocation6 + $0x60] sm:$0xff]   ;;  %v831_v61 = vld [vmem:[#allocation6 + $0x68] sm:$0xff]  }
  0x4a   :  { %v830_v60 = vld [vmem:[#allocation6 + $0x20] sm:$0xff]   ;;  %v832_v62 = vld [vmem:[#allocation6 + $0x28] sm:$0xff]   ;;  %v833_v16 = vld [vmem:[#allocation6 + $0x70] sm:$0xff]  }
  0x4b   :  { %v86_v2 = vld [vmem:[%s1015_s2] sm:$0x3]  ;;  %v835_v18 = vld [vmem:[#allocation6 + $0x78] sm:$0xff]  }
  0x4c   :  { %189 = vmatpush1.bf16.msra.mxu0 %v766_v17  ;;  %436 = vmatpush1.bf16.msra.mxu1 %v787_v27  ;;  %v91_v4 = vrot.slane %v86_v2, %v90_v1  ;;  %v95_v5 = vrot.slane %v86_v2, %v94_v3  ;;  %v834_v17 = vld [vmem:[#allocation6 + $0x30] sm:$0xff]   ;;  %v836_v19 = vld [vmem:[#allocation6 + $0x38] sm:$0xff]  }
  0x4d   :  { %190 = vmatprep.subr.bf16.mxu0 %v767_v20  ;;  %437 = vmatprep.subr.bf16.mxu1 %v788_v28  ;;  %v255_v20 = vld [vmem:[%s1017_s4] sm:$0x3] }
  0x4e   :  { %v264_v22 = vrot.slane %v255_v20, %v94_v3 }
  0x50   :  { %191 = vmatpush1.bf16.msra.mxu0 %v769_v21  ;;  %438 = vmatpush1.bf16.msra.mxu1 %v790_v29  ;;  %v260_v21 = vrot.slane %v255_v20, %v90_v1 }
  0x51   :  { %192 = vmatprep.subr.bf16.mxu0 %v770_v24  ;;  %439 = vmatprep.subr.bf16.mxu1 %v791_v30 }
  0x54   :  { %193 = vmatpush1.bf16.msra.mxu0 %v772_v25  ;;  %440 = vmatpush1.bf16.msra.mxu1 %v793_v32 }
  0x55   :  { %441 = vmatprep.subr.bf16.mxu1 %v794_v33  ;;  %719 = vmatprep.subr.bf16.mxu0 %v821_v51 }
  0x57   :  { %211 = vmatmul.mubr.bf16.vlgmr.msra.gmra.mrb[0].mxu0 %v69_v31 }
  0x58   :  { %442 = vmatpush1.bf16.msra.mxu1 %v796_v34  ;;  %720 = vmatpush3.bf16.msra.mxu0 %v822_v52  ;;  %v702_v34 = vld [vmem:[%s1019_s6] ss:$0 sm:$0xff] }
  0x59   :  { %443 = vmatprep.subr.bf16.mxu1 %v797_v35  ;;  %721 = vmatprep.subr.bf16.mxu0 %v823_v53 }
  0x5c   :  { %444 = vmatpush1.bf16.msra.mxu1 %v799_v36  ;;  %722 = vmatpush3.bf16.msra.mxu0 %v824_v54 }
  0x5d   :  { %445 = vmatprep.subr.bf16.mxu1 %v800_v37  ;;  %723 = vmatprep.subr.bf16.mxu0 %v825_v55 }
  0x60   :  { %446 = vmatpush1.bf16.msra.mxu1 %v802_v38  ;;  %724 = vmatpush3.bf16.msra.mxu0 %v826_v56 }
  0x61   :  { %447 = vmatprep.subr.bf16.mxu1 %v803_v39  ;;  %725 = vmatprep.subr.bf16.mxu0 %v827_v57 }
  0x64   :  { %448 = vmatpush1.bf16.msra.mxu1 %v805_v40  ;;  %726 = vmatpush3.bf16.msra.mxu0 %v828_v58 }
  0x65   :  { %449 = vmatprep.subr.bf16.mxu1 %v806_v41  ;;  %727 = vmatprep.subr.bf16.mxu0 %v829_v59 }
  0x68   :  { %450 = vmatpush1.bf16.msra.mxu1 %v808_v42  ;;  %728 = vmatpush3.bf16.msra.mxu0 %v830_v60 }
  0x69   :  { %451 = vmatprep.subr.bf16.mxu1 %v809_v43  ;;  %729 = vmatprep.subr.bf16.mxu0 %v831_v61 }
  0x6c   :  { %452 = vmatpush1.bf16.msra.mxu1 %v811_v44  ;;  %730 = vmatpush3.bf16.msra.mxu0 %v832_v62 }
  0x6d   :  { %453 = vmatprep.subr.bf16.mxu1 %v812_v45  ;;  %731 = vmatprep.subr.bf16.mxu0 %v833_v16 }
  0x70   :  { %454 = vmatpush1.bf16.msra.mxu1 %v814_v46  ;;  %732 = vmatpush3.bf16.msra.mxu0 %v834_v17 }
  0x71   :  { %455 = vmatprep.subr.bf16.mxu1 %v815_v47  ;;  %733 = vmatprep.subr.bf16.mxu0 %v835_v18 }
  0x74   :  { %456 = vmatpush1.bf16.msra.mxu1 %v817_v48  ;;  %734 = vmatpush3.bf16.msra.mxu0 %v836_v19 }
  0x75   :  { %457 = vmatprep.subr.bf16.mxu1 %v818_v49 }
  0x78   :  { %458 = vmatpush1.bf16.msra.mxu1 %v820_v50 }
 0x12a   :  { %v212_v6 = vpop.f32.mrb[0].mxu0 }
 0x12b   :  { %v213_v7 = vadd.f32 %v212_v6, %v91_v4  ;;  %v214_v8 = vpop.f32.mrb[1].mxu0 }
 0x12c   :  { %v215_v9 = vadd.f32 %v214_v8, %v95_v5  ;;  %v216_v10 = vpop.f32.mrb[2].mxu0 }
 0x12d   :  { %v219_v11 = vmax.f32 %v213_v7, 0.0  ;;  %v217_v12 = vpop.f32.mrb[3].mxu0 }
 0x12e   :  { %v220_v13 = vmax.f32 %v215_v9, 0.0 }
 0x12f   :  { %v221_v15 = vpack.c.bf16 %v219_v11, %v219_v11 }
 0x130   :  { %v222_v14 = vpack.c.bf16 %v220_v13, %v220_v13 }
 0x132   :  { %459 = vmatprep.mubr.bf16.mxu1 %v222_v14 }
 0x133   :  { %460 = vmatmul.mubr.bf16.vlgmr.msra.gmra.mrb[0].mxu1 %v221_v15 }
 0x206   :  { %v461_v23 = vpop.f32.mrb[0].mxu1 }
 0x207   :  { %v462_v24 = vadd.f32 %v461_v23, %v260_v21  ;;  %v463_v25 = vpop.f32.mrb[1].mxu1 }
 0x208   :  { %v464_v26 = vadd.f32 %v463_v25, %v264_v22  ;;  %v465_v27 = vpop.f32.mrb[2].mxu1 }
 0x209   :  { %v468_v28 = vmax.f32 %v462_v24, 0.0  ;;  %v466_v29 = vpop.f32.mrb[3].mxu1 }
 0x20a   :  { %v469_v30 = vmax.f32 %v464_v26, 0.0 }
 0x20b   :  { %v470_v32 = vpack.c.bf16 %v468_v28, %v468_v28 }
 0x20c   :  { %v471_v31 = vpack.c.bf16 %v469_v30, %v469_v30 }
 0x20e   :  { %639 = vmatprep.mubr.bf16.mxu0 %v471_v31 }
 0x20f   :  { %640 = vmatmul.mubr.bf16.vlgmr.msra.gmra.mrb[4].mxu0 %v470_v32 }
 0x2e2   :  { %v735_v33 = vpop.f32.mrb[4].mxu0 }
 0x2e3   :  { %v736_v35 = vpop.f32.mrb[5].mxu0 }
 0x2e4   :  { %v737_v36 = vadd.f32 %v736_v35, %v735_v33  ;;  %v738_v37 = vpop.f32.mrb[6].mxu0 }
 0x2e5   :  { %v739_v38 = vpop.f32.mrb[7].mxu0 }
 0x2e6   :  { %v642_v39 = vadd.f32 %v737_v36, %v702_v34 }
 0x2e8   :  { %647 = vst [vmem:[%s1020_s7] sm:$0xff] %v642_v39 }
 0x2e9   :  { %652 = vsyncpa [#allocation3], 1 }
 0x2ea   :  { %653 = vsyncpa [#allocation5], 1 }

</bundles_post_ra>
